<compile_context>
chip_gen: v6e
topology: v6e:2x2x1
jax: 0.10.0
libtpu: 0.0.40
codegen_flags: <defaults>
</compile_context>

<pallas_src>
import jax
import jax.numpy as jnp
from jax.experimental import pallas as pl
from jax.experimental.pallas import tpu as pltpu

_LANE = 128
# Sublane multiple by itemsize: f32 -> 8, bf16/f16 -> 16, int8/fp8 -> 32.
_SUBLANE_BY_ITEMSIZE = {4: 8, 2: 16, 1: 32}
# ~2 MiB per buffer.  With in+out double-buffered that is ~8 MiB, and with
# 3-deep buffering ~12 MiB -- under the explicit 32 MiB scoped VMEM limit on
# all of v5e / v6e / v7x.
_TARGET_BLOCK_BYTES = 2 << 20
_VMEM_LIMIT_BYTES = 32 << 20


def _copy_kernel(x_ref, o_ref):
    # Pure elementwise pass-through (the only well-defined "compute" of the
    # abstract base FeatureExtractor).
    o_ref[...] = x_ref[...]


def _make_spec(shape, index_map, deep):
    """BlockSpec with optional 3-deep buffering; falls back if unsupported."""
    if deep and hasattr(pl, "Buffered"):
        try:
            return pl.BlockSpec(shape, index_map, pipeline_mode=pl.Buffered(3))
        except TypeError:
            pass
    return pl.BlockSpec(shape, index_map)


def _identity_impl(x: jax.Array) -> jax.Array:
    """Identity feature pass routed through a tiled, lane-dense Pallas kernel."""
    orig_shape = x.shape
    dtype = x.dtype
    total = int(x.size)
    if total == 0:
        return x

    itemsize = jnp.dtype(dtype).itemsize
    sub = _SUBLANE_BY_ITEMSIZE.get(itemsize, 8)

    # Flatten and pad to a multiple of 128 lanes so EVERY size goes through
    # the same lane-dense tiled path (no masked-store / whole-array fallback).
    flat = x.reshape(total)
    pad_total = total
    if total % _LANE != 0:
        pad_total = ((total + _LANE - 1) // _LANE) * _LANE
        flat = jnp.pad(flat, (0, pad_total - total))

    # Widest lane-dense last dim that divides the (padded) size.
    lane = _LANE
    for cand in (1024, 512, 256):
        if pad_total % cand == 0:
            lane = cand
            break

    rows = pad_total // lane
    target_rows = max(sub, (_TARGET_BLOCK_BYTES // (lane * itemsize)) // sub * sub)
    if rows >= 2 * sub:
        # Cap at ~rows/2 (sublane-aligned) so grid >= 2: both v7x TensorCores
        # get work on the "parallel" axis even for small/medium arrays.
        half_rows = max(sub, (rows // 2) // sub * sub)
        tile_rows = min(target_rows, half_rows)
    else:
        # Full-extent block: the (8,128) divisibility rule does not apply.
        tile_rows = rows
    grid = pl.cdiv(rows, tile_rows)

    # Zero-FLOP, bandwidth-only custom call: tell XLA's scheduler so.
    cost = pl.CostEstimate(
        flops=0, transcendentals=0, bytes_accessed=2 * pad_total * itemsize
    )
    # No compute to hide DMA turnaround behind -> deeper buffering when the
    # grid is long enough to profit from it.
    deep = grid >= 4

    out2 = pl.pallas_call(
        _copy_kernel,
        out_shape=jax.ShapeDtypeStruct((rows, lane), dtype),
        grid_spec=pl.GridSpec(
            grid=(grid,),
            in_specs=[_make_spec((tile_rows, lane), lambda i: (i, 0), deep)],
            out_specs=_make_spec((tile_rows, lane), lambda i: (i, 0), deep),
        ),
        compiler_params=pltpu.CompilerParams(
            # Independent blocks -> shard across v7x's two TensorCores;
            # measured no-op on single-TC v5e/v6e.
            dimension_semantics=("parallel",),
            vmem_limit_bytes=_VMEM_LIMIT_BYTES,
        ),
        cost_estimate=cost,
    )(flat.reshape(rows, lane))

    out_flat = out2.reshape(pad_total)
    if pad_total != total:
        out_flat = out_flat[:total]
    return out_flat.reshape(orig_shape)


# jit so the reshape/pad/kernel/slice sequence is one dispatch and the
# wrapper-side reshapes stay metadata-only.
_pallas_identity = jax.jit(_identity_impl)


class FeatureExtractor:
    """JAX/Pallas mirror of the abstract PyTorch FeatureExtractor."""

    def __init__(self, feat_size: int = 512):
        self.feat_size = feat_size  # no parameters are created in the reference

    def make_batch(self, data, device=None, pretrain: bool = False):
        # TODO(synk): abstract in the reference module (raises NotImplementedError).
        raise NotImplementedError

    def load_emb(self, emb):
        # Reference implementation is `pass` (no-op).
        pass

    def forward(self, *inputs):
        # TODO(synk): abstract in the reference (raises NotImplementedError);
        # concrete subclasses override this with real compute.  Here the base
        # class routes the first input through the Pallas identity kernel so a
        # kernel is exercised.  (A production identity would just `return x`:
        # no tiling can beat 2x-bytes of HBM traffic for a pass-through.)
        if not inputs:
            raise NotImplementedError
        return _pallas_identity(inputs[0])

    __call__ = forward


if __name__ == "__main__":
    key = jax.random.PRNGKey(0)
    k1, k2, k3, k4 = jax.random.split(key, 4)

    fe = FeatureExtractor(feat_size=32)  # small feat_size for the synthetic run
    fe.load_emb(None)  # no-op, exactly like the reference

    # 1) Small NCHW-style input (single lane-dense block, grid=1).
    x = jax.random.normal(k1, (2, 4, 16, 16), dtype=jnp.float32)
    out = jax.block_until_ready(fe(x))
    assert out.shape == x.shape and out.dtype == x.dtype
    assert bool(jnp.array_equal(out, x))

    # 2) Size not divisible by 128 -> pad-to-lane path (no masked-store fallback).
    y = jax.random.normal(k2, (3, 5, 7), dtype=jnp.float32)
    out2 = jax.block_until_ready(fe(y))
    assert out2.shape == y.shape
    assert bool(jnp.array_equal(out2, y))

    # 3) bf16 input (sublane multiple of 16).
    z = jax.random.normal(k3, (2, 4, 16, 16), dtype=jnp.bfloat16)
    out3 = jax.block_until_ready(fe(z))
    assert bool(jnp.array_equal(out3, z))

    # 4) Larger input: ~2 MiB tiles, grid=4, "parallel" axis + deep buffering.
    w = jax.random.normal(k4, (16, 8, 128, 128), dtype=jnp.float32)
    out4 = jax.block_until_ready(fe(w))
    assert bool(jnp.array_equal(out4, w))

    # make_batch / bare forward remain abstract, mirroring the reference.
    try:
        fe.make_batch(None, device=None)
        raise AssertionError("make_batch should be abstract")
    except NotImplementedError:
        pass

    print("KERNEL_OK")
</pallas_src>

<mosaic_0001>
module attributes {stable_mosaic.version = 11 : i64} {
  func.func @_copy_kernel(%arg0: i32, %arg1: memref<2x1024xf32, #tpu.memory_space<vmem>>, %arg2: memref<2x1024xf32, #tpu.memory_space<vmem>>) attributes {dimension_semantics = [#tpu.dimension_semantics<parallel>], iteration_bounds = array<i64: 1>, scalar_prefetch = 0 : i64, scratch_operands = 0 : i64, tpu.core_type = #tpu.core_type<tc>, window_params = [{transform_indices = @transform_0, window_bounds = array<i64: 2, 1024>}, {transform_indices = @transform_1, window_bounds = array<i64: 2, 1024>}]} {
    %c0 = arith.constant 0 : index
    %c0_0 = arith.constant 0 : index
    %0 = vector.load %arg1[%c0, %c0_0] : memref<2x1024xf32, #tpu.memory_space<vmem>>, vector<2x1024xf32>
    %c0_1 = arith.constant 0 : index
    %c0_2 = arith.constant 0 : index
    %1 = vector.load %arg2[%c0_1, %c0_2] : memref<2x1024xf32, #tpu.memory_space<vmem>>, vector<2x1024xf32>
    tpu.vector_store %arg2[%c0_1, %c0_2], %0 {strides = array<i32>} : memref<2x1024xf32, #tpu.memory_space<vmem>>, vector<2x1024xf32>,
    return
  }
  func.func @transform_0(%arg0: i32) -> (i32, i32) {
    %c0_i32 = arith.constant 0 : i32
    %c0_i32_0 = arith.constant 0 : i32
    return %arg0, %c0_i32 : i32, i32
  }
  func.func @transform_1(%arg0: i32) -> (i32, i32) {
    %c0_i32 = arith.constant 0 : i32
    %c0_i32_0 = arith.constant 0 : i32
    return %arg0, %c0_i32 : i32, i32
  }
}

</mosaic_0001>

<bundles_post_ra>
// kernel: _identity_impl.1
= control target key start
LH: loop header
LB: loop body
LE: loop exit
PB: predicated region body
PF: predicated region fallthrough
CT: control target
= control target key end

     0   :  { %s38_s0 = inlined_call_operand.vmem [shape: f32[2,1024], index: 0, kind: input, shape index: {}]   ;;  %s39_s1 = inlined_call_operand.vmem [shape: f32[2,1024], index: 1, kind: output, shape index: {}]  }
   0x1   :  { %v8_v0 = vld [vmem:[%s38_s0] sm:$0xff]  ;;  %v9_v1 = vld [vmem:[%s38_s0 + $0x8] sm:$0xff] }
   0x2   :  { %10 = vst [vmem:[%s39_s1] sm:$0xff] %v8_v0  ;;  %11 = vst [vmem:[%s39_s1 + $0x8] sm:$0xff] %v9_v1 }

</bundles_post_ra>
